<compile_context>
chip_gen: v7x
topology: tpu7x:2x2x1
jax: 0.10.0
libtpu: 0.0.40
codegen_flags: <defaults>
</compile_context>

<pallas_src>
import functools

import jax
import jax.numpy as jnp
from jax import lax
from jax.experimental import pallas as pl
from jax.experimental.pallas import tpu as pltpu


def object_model_kernel(c_ref, w1_ref, b1_ref, w2_ref, b2_ref, w3_ref, b3_ref,
                        o_ref, *, compute_dtype, row_chunk):
    """Fused MLP: relu(relu(x @ W1 + b1) @ W2 + b2) @ W3 + b3.

    Weights arrive already in `compute_dtype`; accumulation, bias add and ReLU
    stay in f32.
    """
    # Tiny weights/biases: load once per grid step (VMEM-resident via constant
    # index_maps), no per-step casts.
    w1 = w1_ref[...]
    w2 = w2_ref[...]
    w3 = w3_ref[...]
    b1 = b1_ref[...].astype(jnp.float32)
    b2 = b2_ref[...].astype(jnp.float32)
    b3 = b3_ref[...].astype(jnp.float32)

    def mlp(x):
        h1 = jnp.dot(x, w1, preferred_element_type=jnp.float32)
        h1 = jnp.maximum(h1 + b1, 0.0)
        h2 = jnp.dot(h1.astype(compute_dtype), w2,
                     preferred_element_type=jnp.float32)
        h2 = jnp.maximum(h2 + b2, 0.0)
        out = jnp.dot(h2.astype(compute_dtype), w3,
                      preferred_element_type=jnp.float32)
        return out + b3

    tile_rows = c_ref.shape[0]
    if row_chunk is None or tile_rows <= row_chunk or tile_rows % row_chunk != 0:
        # Single shot over the whole row tile.
        x = c_ref[...].astype(compute_dtype)
        o_ref[...] = mlp(x).astype(o_ref.dtype)
    else:
        # Fixed-size row slabs keep h1/h2/out in vregs instead of spilling the
        # whole-tile intermediates to VMEM (matters most on v5e: 1 vst slot).
        n_chunks = tile_rows // row_chunk

        def body(c, carry):
            r0 = pl.multiple_of(c * row_chunk, row_chunk)
            x = c_ref[pl.ds(r0, row_chunk), :].astype(compute_dtype)
            o_ref[pl.ds(r0, row_chunk), :] = mlp(x).astype(o_ref.dtype)
            return carry

        lax.fori_loop(0, n_chunks, body, 0, unroll=True)


def object_model_forward(C, params, *, tile_n=1024, compute_dtype=jnp.bfloat16,
                         out_dtype=None, row_chunk=256):
    """Pallas wrapper.

    C: [N, input_size]. params: dict of W1,b1,W2,b2,W3,b3 with Wi stored as
    [in, out] and bi as [1, out]. No padded copies of C or the output are made.
    """
    N, in_size = C.shape
    hidden = params["W1"].shape[1]
    out_size = params["W3"].shape[1]
    out_dtype = C.dtype if out_dtype is None else out_dtype

    # Pre-cast weights once (ideally done at init time); biases stay f32 for
    # the f32 accumulate / bias / ReLU path.
    W1 = params["W1"].astype(compute_dtype)
    W2 = params["W2"].astype(compute_dtype)
    W3 = params["W3"].astype(compute_dtype)
    b1, b2, b3 = params["b1"], params["b2"], params["b3"]

    def _round_up(x, m):
        return pl.cdiv(x, m) * m

    # Row tile: large enough to amortize the ~0.35us per-grid-step overhead,
    # small enough that both v7x TensorCores get at least one tile, and capped
    # at 4096 rows to stay within v7x's 64 MiB VMEM at f32 intermediates.
    tile_n = max(8, min(tile_n, 4096, _round_up(pl.cdiv(N, 2), 8)))
    tile_n = _round_up(tile_n, 8)
    if row_chunk is not None and tile_n > row_chunk:
        tile_n = _round_up(tile_n, row_chunk)

    # Ragged last tile is handled by Pallas partial-block masking: only valid
    # rows are copied in/out, so no jnp.pad copy of C and no output row slice.
    grid = (pl.cdiv(N, tile_n),)

    in_specs = [
        pl.BlockSpec((tile_n, in_size), lambda i: (i, 0)),   # C row tile
        pl.BlockSpec((in_size, hidden), lambda i: (0, 0)),   # W1 (resident)
        pl.BlockSpec((1, hidden), lambda i: (0, 0)),          # b1
        pl.BlockSpec((hidden, hidden), lambda i: (0, 0)),     # W2
        pl.BlockSpec((1, hidden), lambda i: (0, 0)),          # b2
        pl.BlockSpec((hidden, out_size), lambda i: (0, 0)),   # W3
        pl.BlockSpec((1, out_size), lambda i: (0, 0)),         # b3
    ]
    # Output minor dim == full array dim (e.g. 3): legal block shape; the few
    # masked stores per tile are negligible vs. the 42x smaller writeback.
    out_specs = pl.BlockSpec((tile_n, out_size), lambda i: (i, 0))

    kernel = functools.partial(object_model_kernel,
                               compute_dtype=compute_dtype,
                               row_chunk=row_chunk)

    return pl.pallas_call(
        kernel,
        out_shape=jax.ShapeDtypeStruct((N, out_size), out_dtype),
        grid_spec=pltpu.PrefetchScalarGridSpec(
            num_scalar_prefetch=0,
            grid=grid,
            in_specs=in_specs,
            out_specs=out_specs,
        ),
        compiler_params=pltpu.CompilerParams(
            # Row tiles are independent -> shard across TensorCores (v7x).
            dimension_semantics=("parallel",),
        ),
    )(C, W1, b1, W2, b2, W3, b3)


def init_params(key, input_size, output_size, hidden_size, dtype=jnp.float32):
    """Deterministic synthetic init (same shapes as the torch module)."""
    k1, k2, k3, k4, k5, k6 = jax.random.split(key, 6)
    scale = 0.1
    return {
        "W1": scale * jax.random.normal(k1, (input_size, hidden_size), dtype),
        "b1": scale * jax.random.normal(k2, (1, hidden_size), dtype),
        "W2": scale * jax.random.normal(k3, (hidden_size, hidden_size), dtype),
        "b2": scale * jax.random.normal(k4, (1, hidden_size), dtype),
        "W3": scale * jax.random.normal(k5, (hidden_size, output_size), dtype),
        "b3": scale * jax.random.normal(k6, (1, output_size), dtype),
    }


def reference_forward(C, p):
    h1 = jnp.maximum(C @ p["W1"] + p["b1"], 0.0)
    h2 = jnp.maximum(h1 @ p["W2"] + p["b2"], 0.0)
    return h2 @ p["W3"] + p["b3"]


if __name__ == "__main__":
    # ObjectModel(input_size=6, output_size=3, hidden_size=32); C: [N, 6]
    input_size, output_size, hidden_size = 6, 3, 32

    key = jax.random.PRNGKey(0)
    k_c, k_p = jax.random.split(key)
    params = init_params(k_p, input_size, output_size, hidden_size)

    # 1) Exact f32 MXU path, tiny batch (tile divides N): tight tolerance.
    N = 16
    C = jax.random.normal(k_c, (N, input_size), jnp.float32)
    ref = reference_forward(C, params)
    out = jax.block_until_ready(
        object_model_forward(C, params, compute_dtype=jnp.float32))
    assert out.shape == (N, output_size)
    assert jnp.allclose(out, ref, atol=1e-5, rtol=1e-5)

    # 2) Default bf16 path, ragged N (partial last grid tile): relaxed tol.
    N = 300
    C2 = jax.random.normal(jax.random.PRNGKey(1), (N, input_size), jnp.float32)
    ref2 = reference_forward(C2, params)
    out2 = jax.block_until_ready(object_model_forward(C2, params))
    assert out2.shape == (N, output_size)
    assert jnp.allclose(out2, ref2, atol=3e-2, rtol=1e-1)

    # 3) bf16 path exercising the in-kernel row-chunk loop + partial tile.
    N = 1200
    C3 = jax.random.normal(jax.random.PRNGKey(2), (N, input_size), jnp.float32)
    ref3 = reference_forward(C3, params)
    out3 = jax.block_until_ready(object_model_forward(C3, params))
    assert out3.shape == (N, output_size)
    assert jnp.allclose(out3, ref3, atol=3e-2, rtol=1e-1)

    print("KERNEL_OK")
</pallas_src>

<mosaic_0001>
module attributes {stable_mosaic.version = 11 : i64} {
  func.func @object_model_kernel(%arg0: i32, %arg1: memref<8x6xf32, #tpu.memory_space<vmem>>, %arg2: memref<6x32xf32, #tpu.memory_space<vmem>>, %arg3: memref<1x32xf32, #tpu.memory_space<vmem>>, %arg4: memref<32x32xf32, #tpu.memory_space<vmem>>, %arg5: memref<1x32xf32, #tpu.memory_space<vmem>>, %arg6: memref<32x3xf32, #tpu.memory_space<vmem>>, %arg7: memref<1x3xf32, #tpu.memory_space<vmem>>, %arg8: memref<8x3xf32, #tpu.memory_space<vmem>>) attributes {dimension_semantics = [#tpu.dimension_semantics<parallel>], iteration_bounds = array<i64: 2>, scalar_prefetch = 0 : i64, scratch_operands = 0 : i64, tpu.core_type = #tpu.core_type<tc>, window_params = [{transform_indices = @transform_0, window_bounds = array<i64: 8, 6>}, {pipeline_mode = #tpu.pipeline_mode<synchronous>, transform_indices = @transform_1, window_bounds = array<i64: 6, 32>}, {pipeline_mode = #tpu.pipeline_mode<synchronous>, transform_indices = @transform_2, window_bounds = array<i64: 1, 32>}, {pipeline_mode = #tpu.pipeline_mode<synchronous>, transform_indices = @transform_3, window_bounds = array<i64: 32, 32>}, {pipeline_mode = #tpu.pipeline_mode<synchronous>, transform_indices = @transform_4, window_bounds = array<i64: 1, 32>}, {pipeline_mode = #tpu.pipeline_mode<synchronous>, transform_indices = @transform_5, window_bounds = array<i64: 32, 3>}, {pipeline_mode = #tpu.pipeline_mode<synchronous>, transform_indices = @transform_6, window_bounds = array<i64: 1, 3>}, {transform_indices = @transform_7, window_bounds = array<i64: 8, 3>}]} {
    %c0 = arith.constant 0 : index
    %c0_0 = arith.constant 0 : index
    %0 = vector.load %arg2[%c0, %c0_0] : memref<6x32xf32, #tpu.memory_space<vmem>>, vector<6x32xf32>
    %c0_1 = arith.constant 0 : index
    %c0_2 = arith.constant 0 : index
    %1 = vector.load %arg4[%c0_1, %c0_2] : memref<32x32xf32, #tpu.memory_space<vmem>>, vector<32x32xf32>
    %c0_3 = arith.constant 0 : index
    %c0_4 = arith.constant 0 : index
    %2 = vector.load %arg6[%c0_3, %c0_4] : memref<32x3xf32, #tpu.memory_space<vmem>>, vector<32x3xf32>
    %c0_5 = arith.constant 0 : index
    %c0_6 = arith.constant 0 : index
    %3 = vector.load %arg3[%c0_5, %c0_6] : memref<1x32xf32, #tpu.memory_space<vmem>>, vector<1x32xf32>
    %c0_7 = arith.constant 0 : index
    %c0_8 = arith.constant 0 : index
    %4 = vector.load %arg5[%c0_7, %c0_8] : memref<1x32xf32, #tpu.memory_space<vmem>>, vector<1x32xf32>
    %c0_9 = arith.constant 0 : index
    %c0_10 = arith.constant 0 : index
    %5 = vector.load %arg7[%c0_9, %c0_10] : memref<1x3xf32, #tpu.memory_space<vmem>>, vector<1x3xf32>
    %c0_11 = arith.constant 0 : index
    %c0_12 = arith.constant 0 : index
    %6 = vector.load %arg1[%c0_11, %c0_12] : memref<8x6xf32, #tpu.memory_space<vmem>>, vector<8x6xf32>
    %cst = arith.constant dense<0.000000e+00> : vector<8x32xf32>
    %7 = tpu.matmul %6, %0, %cst {dimension_numbers = #tpu.dot_dimension_numbers<[1], [0], [0], [1], [0, 0, 1, 1], [], []>} : vector<8x6xf32>, vector<6x32xf32>, vector<8x32xf32> -> vector<8x32xf32>
    %8 = vector.broadcast %3 : vector<1x32xf32> to vector<8x32xf32>
    %9 = arith.addf %7, %8 : vector<8x32xf32>
    %cst_13 = arith.constant 0.000000e+00 : f32
    %10 = vector.broadcast %cst_13 : f32 to vector<8x32xf32>
    %11 = arith.maximumf %9, %10 : vector<8x32xf32>
    %cst_14 = arith.constant dense<0.000000e+00> : vector<8x32xf32>
    %12 = tpu.matmul %11, %1, %cst_14 {dimension_numbers = #tpu.dot_dimension_numbers<[1], [0], [0], [1], [0, 0, 1, 1], [], []>} : vector<8x32xf32>, vector<32x32xf32>, vector<8x32xf32> -> vector<8x32xf32>
    %13 = vector.broadcast %4 : vector<1x32xf32> to vector<8x32xf32>
    %14 = arith.addf %12, %13 : vector<8x32xf32>
    %cst_15 = arith.constant 0.000000e+00 : f32
    %15 = vector.broadcast %cst_15 : f32 to vector<8x32xf32>
    %16 = arith.maximumf %14, %15 : vector<8x32xf32>
    %cst_16 = arith.constant dense<0.000000e+00> : vector<8x3xf32>
    %17 = tpu.matmul %16, %2, %cst_16 {dimension_numbers = #tpu.dot_dimension_numbers<[1], [0], [0], [1], [0, 0, 1, 1], [], []>} : vector<8x32xf32>, vector<32x3xf32>, vector<8x3xf32> -> vector<8x3xf32>
    %18 = vector.broadcast %5 : vector<1x3xf32> to vector<8x3xf32>
    %19 = arith.addf %17, %18 : vector<8x3xf32>
    %c0_17 = arith.constant 0 : index
    %c0_18 = arith.constant 0 : index
    %20 = vector.load %arg8[%c0_17, %c0_18] : memref<8x3xf32, #tpu.memory_space<vmem>>, vector<8x3xf32>
    tpu.vector_store %arg8[%c0_17, %c0_18], %19 {strides = array<i32>} : memref<8x3xf32, #tpu.memory_space<vmem>>, vector<8x3xf32>,
    return
  }
  func.func @transform_0(%arg0: i32) -> (i32, i32) {
    %c0_i32 = arith.constant 0 : i32
    %c0_i32_0 = arith.constant 0 : i32
    return %arg0, %c0_i32 : i32, i32
  }
  func.func @transform_1(%arg0: i32) -> (i32, i32) {
    %c0_i32 = arith.constant 0 : i32
    %c0_i32_0 = arith.constant 0 : i32
    %c0_i32_1 = arith.constant 0 : i32
    return %c0_i32, %c0_i32_0 : i32, i32
  }
  func.func @transform_2(%arg0: i32) -> (i32, i32) {
    %c0_i32 = arith.constant 0 : i32
    %c0_i32_0 = arith.constant 0 : i32
    %c0_i32_1 = arith.constant 0 : i32
    return %c0_i32, %c0_i32_0 : i32, i32
  }
  func.func @transform_3(%arg0: i32) -> (i32, i32) {
    %c0_i32 = arith.constant 0 : i32
    %c0_i32_0 = arith.constant 0 : i32
    %c0_i32_1 = arith.constant 0 : i32
    return %c0_i32, %c0_i32_0 : i32, i32
  }
  func.func @transform_4(%arg0: i32) -> (i32, i32) {
    %c0_i32 = arith.constant 0 : i32
    %c0_i32_0 = arith.constant 0 : i32
    %c0_i32_1 = arith.constant 0 : i32
    return %c0_i32, %c0_i32_0 : i32, i32
  }
  func.func @transform_5(%arg0: i32) -> (i32, i32) {
    %c0_i32 = arith.constant 0 : i32
    %c0_i32_0 = arith.constant 0 : i32
    %c0_i32_1 = arith.constant 0 : i32
    return %c0_i32, %c0_i32_0 : i32, i32
  }
  func.func @transform_6(%arg0: i32) -> (i32, i32) {
    %c0_i32 = arith.constant 0 : i32
    %c0_i32_0 = arith.constant 0 : i32
    %c0_i32_1 = arith.constant 0 : i32
    return %c0_i32, %c0_i32_0 : i32, i32
  }
  func.func @transform_7(%arg0: i32) -> (i32, i32) {
    %c0_i32 = arith.constant 0 : i32
    %c0_i32_0 = arith.constant 0 : i32
    return %arg0, %c0_i32 : i32, i32
  }
}

</mosaic_0001>

<bundles_post_ra>
// kernel: tpu_custom_call.1
= control target key start
LH: loop header
LB: loop body
LE: loop exit
PB: predicated region body
PF: predicated region fallthrough
CT: control target
= control target key end

     0   :  { %s716_s24 = smov 0   ;;  %s779_s0 = inlined_call_operand.vmem [shape: f32[16,6], index: 0, kind: input, shape index: {}]   ;;  %s780_s1 = inlined_call_operand.vmem [shape: f32[6,32], index: 1, kind: input, shape index: {}]   ;;  %s781_s2 = inlined_call_operand.vmem [shape: f32[1,32], index: 2, kind: input, shape index: {}]   ;;  %s782_s3 = inlined_call_operand.vmem [shape: f32[32,32], index: 3, kind: input, shape index: {}]   ;;  %s783_s4 = inlined_call_operand.vmem [shape: f32[1,32], index: 4, kind: input, shape index: {}]   ;;  %s784_s5 = inlined_call_operand.vmem [shape: f32[32,3], index: 5, kind: input, shape index: {}]   ;;  %s785_s6 = inlined_call_operand.vmem [shape: f32[1,3], index: 6, kind: input, shape index: {}]   ;;  %s786_s7 = inlined_call_operand.vmem [shape: f32[16,3], index: 7, kind: output, shape index: {}]  }
   0x1 LB: > { %s587_s25 = sadd.s32 4294967295, %s671_s24   ;;  %p591_p0 = scmp.ge.s32.totalorder %s671_s24, 1  ;;  %s671_s24 = sphi %s716_s24, %s17_s24  }
   0x2   : > { %p236_p1 = scmp.lt.s32.totalorder %s671_s24, 3 }
   0x4   : > { %p237_p2 = pnand %p591_p0, %p236_p1 }
   0x5   : > { %v274_v0 = vld [vmem:[%s780_s1] sm:$0x3f] (!%p237_p2)  ;;  %vm297_vm0 = vcmask (!%p237_p2), 1045504   ;;  %p266_p3 = scmp.lt.s32.totalorder (!%p237_p2), %s587_s25, 1  ;;  %v673_v1 = vmov (!%p237_p2), 0.0   ;;  %vm674_vm1 = vmmov (!%p237_p2), 0  }
   0x6   : > { %240 = sbr.rel (%p237_p2) target bundleno = 664 (0x298), region = 48  ;;  %615 = vmatprep.subr.mxu0 (!%p237_p2), %v673_v1  ;;  %617 = vmatprep.mubr.msk.f32.mxu0 (!%p237_p2), %vm674_vm1, %v673_v1  ;;  %v275_v2 = vld [vmem:[%s782_s3] sm:$0xff] (!%p237_p2)  ;;  %v276_v3 = vld [vmem:[%s782_s3 + $0x8] sm:$0xff] (!%p237_p2)  ;;  %v675_v4 = vmov (!%p237_p2), 0.0|0.0   ;;  %vm293_vm2 = vcmask (!%p237_p2), 48128   ;;  %v277_v7 = vld [vmem:[%s782_s3 + $0x10] sm:$0xff] (!%p237_p2) }
   0x7   : > { %616 = vmatpush3.msk.msra.mxu0 (!%p237_p2), %vm297_vm0, %v274_v0  ;;  %642 = vmatprep.subr.bf16.mxu1 (!%p237_p2), %v675_v4  ;;  %v643_v5 = vpack.c.bf16 (!%p237_p2), %v276_v3, %v275_v2  ;;  %v278_v8 = vld [vmem:[%s782_s3 + $0x18] sm:$0xff] (!%p237_p2)  ;;  %v279_v10 = vld [vmem:[%s784_s5] sm:$0xff] (!%p237_p2)  ;;  %v280_v11 = vld [vmem:[%s784_s5 + $0x8] sm:$0xff] (!%p237_p2)  ;;  %vm378_vm3 = vcmask (!%p237_p2), 261120   ;;  %vm532_vm4 = vcmask (!%p237_p2), 23552  }
   0x8   : > { %628 = vmatprep.mubr.msk.f32.mxu1 (!%p237_p2), %vm674_vm1, %v673_v1  ;;  %648 = vmatprep.subr.bf16.mxu0 (!%p237_p2), %v675_v4  ;;  %v646_v9 = vpack.c.bf16 (!%p237_p2), %v278_v8, %v277_v7  ;;  %v649_v12 = vpack.c.bf16 (!%p237_p2), %v280_v11, %v279_v10  ;;  %v594_v13 = vld [vmem:[%s781_s2] ss:$0 sm:$0xff] (!%p237_p2)  ;;  %v281_v18 = vld [vmem:[%s784_s5 + $0x10] sm:$0xff] (!%p237_p2)  ;;  %v282_v19 = vld [vmem:[%s784_s5 + $0x18] sm:$0xff] (!%p237_p2) }
   0x9   : > { %644 = vmatpush3.bf16.msra.mxu1 (!%p237_p2), %v643_v5  ;;  %v652_v20 = vpack.c.bf16 (!%p237_p2), %v282_v19, %v281_v18  ;;  %v597_v21 = vld [vmem:[%s783_s4] ss:$0 sm:$0xff] (!%p237_p2) }
   0xa   : > { %645 = vmatprep.subr.bf16.mxu1 (!%p237_p2), %v675_v4  ;;  %v599_v26 = vld [vmem:[%s785_s6] ss:$0 sm:$0xff] (!%p237_p2) }
   0xd   : > { %s788_s25 = smov (!%p266_p3, %s587_s25), 1  ;;  %647 = vmatpush3.bf16.msra.mxu1 %v646_v9 }
   0xe   : > { %s592_s9 = sshll.u32 %s788_s25, 3 }
   0xf   : > { %s269_s12 = scalar_lea.vmem %s779_s0, %s592_s9  ;;  %s273_s13 = scalar_lea.vmem %s786_s7, %s592_s9 }
  0x10   : > { %v286_v6 = vld [vmem:[%s269_s12] sm:$0xff] }
  0x11   : > { %618 = vmatmul.mubr.msk.f32.vlgmr.msra.gmra.mrb[0].mxu0 %vm293_vm2, %v286_v6 }
  0x12   : > { %639 = vmatprep.mubr.msk.f32.mxu0 %vm674_vm1, %v673_v1  ;;  %650 = vmatpush3.bf16.msra.mxu0 %v649_v12 }
  0x13   : > { %651 = vmatprep.subr.bf16.mxu0 %v675_v4 }
  0x16   : > { %653 = vmatpush3.bf16.msra.mxu0 %v652_v20 }
  0xe4   : > { %v367_v14 = vpop.f32.mrb[0].mxu0 }
  0xe5   : > { %v368_v15 = vadd.f32 %v594_v13, %v367_v14  ;;  %v619_v16 = vpop.f32.mrb[1].mxu0 }
  0xe7   : > { %v371_v17 = vmax.f32 %v368_v15, 0.0 }
  0xe9   : > { %629 = vmatmul.mubr.msk.f32.vlgmr.msra.gmra.mrb[0].mxu1 %vm378_vm3, %v371_v17 }
 0x1bc   : > { %v448_v22 = vpop.f32.mrb[0].mxu1 }
 0x1bd   : > { %v449_v23 = vadd.f32 %v597_v21, %v448_v22  ;;  %v630_v24 = vpop.f32.mrb[1].mxu1 }
 0x1bf   : > { %v452_v25 = vmax.f32 %v449_v23, 0.0 }
 0x1c1   : > { %640 = vmatmul.mubr.msk.f32.vlgmr.msra.gmra.mrb[2].mxu0 %vm378_vm3, %v452_v25 }
 0x294   : > { %v528_v27 = vpop.f32.mrb[2].mxu0 }
 0x295   : > { %v529_v28 = vadd.f32 %v599_v26, %v528_v27  ;;  %v641_v29 = vpop.f32.mrb[3].mxu0 }
 0x297   : > { %533 = vst.msk [vmem:[%s273_s13] sm:$0xff] %vm532_vm4, %v529_v28 }
 0x298 PF: > { %s17_s24 = sadd.s32 1, %s671_s24  }
 0x299   : > { %p14_p4 = scmp.ge.s32.totalorder %s17_s24, 4  }
 0x29b   :  { %16 = sbr.rel (!%p14_p4) target bundleno = 1 (0x1), region = 78 }

</bundles_post_ra>
